<compile_context>
chip_gen: v7x
topology: tpu7x:2x2x1
jax: 0.10.0
libtpu: 0.0.40
codegen_flags: <defaults>
</compile_context>

<pallas_src>
import math

import jax
import jax.numpy as jnp
from jax.experimental import pallas as pl
from jax.experimental.pallas import tpu as pltpu


def _plan_tiles(T, dim, batch):
    """Pick a lane-dense time-tile size (t_tile) and padded T for a (B, T*dim) output.

    VMEM budget: double-buffered (batch, L) output block + two double-buffered
    (1, L) constant input tables -> 4 * L * (2*batch + 4) bytes.  Keep under
    ~12 MiB so it fits the default scoped VMEM on v5e (16 MiB) and v6e/v7x.
    """
    budget_elems = max(128, (12 << 20) // (4 * (2 * batch + 4)))
    flat = T * dim
    if flat <= budget_elems:
        return T, T  # single block covering the whole output (no padding needed)
    # multi-tile: each tile's flat (lane) width must be a multiple of 128
    lcm_t = 128 // math.gcd(dim, 128)
    t_tile = max(lcm_t, (budget_elems // dim) // lcm_t * lcm_t)
    t_pad = ((T + t_tile - 1) // t_tile) * t_tile
    return t_tile, t_pad


def positional_encoding(inputs_length, dim, max_len=600, step=None, time_steps=None):
    """JAX/Pallas equivalent of PositionalEncoding.forward.

    inputs_length: int array of shape (batch,)
    Returns (batch, time_steps, dim) float32 when step is None,
            (batch, 1, dim) float32 when step is an int.
    Pass `time_steps` explicitly (e.g. bucketed/padded) to avoid the host sync
    + retrace that `inputs_length.max().item()` implies.
    """
    batch = int(inputs_length.shape[0])
    if step is None:
        if time_steps is None:
            # matches PyTorch .item(); forces a host sync (see docstring)
            time_steps = int(jax.device_get(jnp.max(inputs_length)))
        T = int(time_steps)
        offset = 0
    else:
        T = 1
        offset = int(step)
    assert offset + T <= max_len, "requested positions exceed max_len"

    t_tile, t_pad = _plan_tiles(T, dim, batch)
    L = t_tile * dim
    n_tiles = t_pad // t_tile

    # ---- column-only invariants, hoisted out of the kernel (computed once) ----
    flat_idx = jnp.arange(L, dtype=jnp.int32)
    col = flat_idx % dim
    pos_local = (flat_idx // dim).astype(jnp.float32)
    inv_freq = jnp.exp(
        (2 * (col // 2)).astype(jnp.float32) * (-(math.log(10000.0) / float(dim)))
    )
    # cos(x) == sin(x + pi/2): fold the odd-column phase into the base angle so
    # the kernel needs a single sin per element.
    phase = jnp.where(col % 2 == 1, jnp.float32(math.pi / 2.0), jnp.float32(0.0))
    base_angle = (pos_local * inv_freq + phase).reshape(1, L)
    inv_freq = inv_freq.reshape(1, L)

    offset_arr = jnp.array([offset], dtype=jnp.int32)

    def kernel(off_ref, base_ref, invf_ref, out_ref):
        # Starting position of this time tile (scalar, SMEM/sreg math).
        start = (pl.program_id(0) * t_tile + off_ref[0]).astype(jnp.float32)
        # angle = (pos_local + start) * inv_freq + phase, with pos_local*inv_freq+phase
        # precomputed -> one mul + one add per element.
        angle = base_ref[...] + start * invf_ref[...]
        row = jnp.sin(angle)  # (1, L): computed ONCE per tile, independent of batch
        # The batch "repeat" is a free in-block broadcast across sublanes.
        out_ref[...] = jnp.broadcast_to(row, out_ref.shape)

    grid_spec = pltpu.PrefetchScalarGridSpec(
        num_scalar_prefetch=1,  # `offset` lands in SMEM
        grid=(n_tiles,),
        in_specs=[
            # constant index_map -> tables stay resident in VMEM across tiles
            pl.BlockSpec((1, L), lambda t, off: (0, 0)),
            pl.BlockSpec((1, L), lambda t, off: (0, 0)),
        ],
        out_specs=pl.BlockSpec((batch, L), lambda t, off: (0, t)),
        scratch_shapes=[],
    )

    out_flat = pl.pallas_call(
        kernel,
        out_shape=jax.ShapeDtypeStruct((batch, t_pad * dim), jnp.float32),
        grid_spec=grid_spec,
        compiler_params=pltpu.CompilerParams(
            dimension_semantics=("parallel",),  # v7x megacore splits the tiles
        ),
        cost_estimate=pl.CostEstimate(
            flops=3 * t_pad * dim,
            transcendentals=t_pad * dim,
            bytes_accessed=batch * t_pad * dim * 4 + 2 * L * 4,
        ),
    )(offset_arr, base_angle, inv_freq)

    out = out_flat.reshape(batch, t_pad, dim)
    if t_pad != T:
        out = out[:, :T, :]
    return out


def _reference(inputs_length, dim, max_len=600, step=None):
    """Pure-JAX reference matching the PyTorch code exactly."""
    pe = jnp.zeros((max_len, dim), dtype=jnp.float32)
    position = jnp.arange(0, max_len, dtype=jnp.float32)[:, None]
    div_term = jnp.exp(
        jnp.arange(0, dim, 2, dtype=jnp.float32) * -(math.log(10000.0) / dim)
    )
    pe = pe.at[:, 0::2].set(jnp.sin(position * div_term))
    pe = pe.at[:, 1::2].set(jnp.cos(position * div_term))
    pe = pe[None]  # (1, max_len, dim)
    B = inputs_length.shape[0]
    if step is None:
        T = int(jax.device_get(jnp.max(inputs_length)))
        return jnp.tile(pe[:, :T], (B, 1, 1))
    else:
        return jnp.tile(pe[:, step:step + 1], (B, 1, 1))


if __name__ == "__main__":
    key = jax.random.PRNGKey(0)
    batch = 2
    dim = 32
    # deterministic "input lengths" (ints in [1, 8]); max defines time_steps
    inputs_length = jax.random.randint(key, (batch,), minval=1, maxval=9)
    inputs_length = inputs_length.at[0].set(8)  # make max deterministic = 8

    # step=None path
    out = positional_encoding(inputs_length, dim=dim, max_len=600, step=None)
    out = jax.block_until_ready(out)
    ref = _reference(inputs_length, dim=dim, max_len=600, step=None)
    assert out.shape == (batch, 8, dim), out.shape
    # atol accounts for the cos(x) == sin(x + pi/2) fold (sub-ulp phase rounding)
    assert jnp.allclose(out, ref, atol=1e-4), "step=None mismatch"

    # step path
    out_s = positional_encoding(inputs_length, dim=dim, max_len=600, step=5)
    out_s = jax.block_until_ready(out_s)
    ref_s = _reference(inputs_length, dim=dim, max_len=600, step=5)
    assert out_s.shape == (batch, 1, dim), out_s.shape
    assert jnp.allclose(out_s, ref_s, atol=1e-4), "step mismatch"

    print("KERNEL_OK")
</pallas_src>

<mosaic_0001>
module attributes {stable_mosaic.version = 11 : i64} {
  func.func @kernel(%arg0: i32, %arg1: memref<1xi32, #tpu.memory_space<smem>>, %arg2: memref<1x256xf32, #tpu.memory_space<vmem>>, %arg3: memref<1x256xf32, #tpu.memory_space<vmem>>, %arg4: memref<2x256xf32, #tpu.memory_space<vmem>>) attributes {dimension_semantics = [#tpu.dimension_semantics<parallel>], iteration_bounds = array<i64: 1>, scalar_prefetch = 1 : i64, scratch_operands = 0 : i64, tpu.core_type = #tpu.core_type<tc>, window_params = [{pipeline_mode = #tpu.pipeline_mode<synchronous>, transform_indices = @transform_0, window_bounds = array<i64: 1, 256>}, {pipeline_mode = #tpu.pipeline_mode<synchronous>, transform_indices = @transform_1, window_bounds = array<i64: 1, 256>}, {transform_indices = @transform_2, window_bounds = array<i64: 2, 256>}]} {
    %c8_i32 = arith.constant 8 : i32
    %0 = arith.muli %arg0, %c8_i32 : i32
    %c0 = arith.constant 0 : index
    %1 = memref.load %arg1[%c0] : memref<1xi32, #tpu.memory_space<smem>>
    %2 = arith.addi %0, %1 : i32
    %3 = arith.sitofp %2 : i32 to f32
    %c0_0 = arith.constant 0 : index
    %c0_1 = arith.constant 0 : index
    %4 = vector.load %arg2[%c0_0, %c0_1] : memref<1x256xf32, #tpu.memory_space<vmem>>, vector<1x256xf32>
    %c0_2 = arith.constant 0 : index
    %c0_3 = arith.constant 0 : index
    %5 = vector.load %arg3[%c0_2, %c0_3] : memref<1x256xf32, #tpu.memory_space<vmem>>, vector<1x256xf32>
    %6 = vector.broadcast %3 : f32 to vector<1x256xf32>
    %7 = arith.mulf %6, %5 : vector<1x256xf32>
    %8 = arith.addf %4, %7 : vector<1x256xf32>
    %9 = math.sin %8 : vector<1x256xf32>
    %10 = vector.shape_cast %9 : vector<1x256xf32> to vector<1x256xf32>
    %11 = vector.broadcast %10 : vector<1x256xf32> to vector<2x256xf32>
    %c0_4 = arith.constant 0 : index
    %c0_5 = arith.constant 0 : index
    %12 = vector.load %arg4[%c0_4, %c0_5] : memref<2x256xf32, #tpu.memory_space<vmem>>, vector<2x256xf32>
    tpu.vector_store %arg4[%c0_4, %c0_5], %11 {strides = array<i32>} : memref<2x256xf32, #tpu.memory_space<vmem>>, vector<2x256xf32>,
    return
  }
  func.func @transform_0(%arg0: i32, %arg1: memref<1xi32, #tpu.memory_space<smem>>) -> (i32, i32) {
    %c0_i32 = arith.constant 0 : i32
    %c0_i32_0 = arith.constant 0 : i32
    %c0_i32_1 = arith.constant 0 : i32
    return %c0_i32, %c0_i32_0 : i32, i32
  }
  func.func @transform_1(%arg0: i32, %arg1: memref<1xi32, #tpu.memory_space<smem>>) -> (i32, i32) {
    %c0_i32 = arith.constant 0 : i32
    %c0_i32_0 = arith.constant 0 : i32
    %c0_i32_1 = arith.constant 0 : i32
    return %c0_i32, %c0_i32_0 : i32, i32
  }
  func.func @transform_2(%arg0: i32, %arg1: memref<1xi32, #tpu.memory_space<smem>>) -> (i32, i32) {
    %c0_i32 = arith.constant 0 : i32
    %c0_i32_0 = arith.constant 0 : i32
    return %c0_i32, %arg0 : i32, i32
  }
}

</mosaic_0001>

<bundles_post_ra>
// kernel: tpu_custom_call.1
= control target key start
LH: loop header
LB: loop body
LE: loop exit
PB: predicated region body
PF: predicated region fallthrough
CT: control target
= control target key end

     0   :  { %s273_s0 = inlined_call_operand.<no memory space> [shape: s32[1], index: 0, kind: input, shape index: {}]   ;;  %s274_s1 = inlined_call_operand.vmem [shape: f32[1,256], index: 1, kind: input, shape index: {}]   ;;  %s275_s2 = inlined_call_operand.vmem [shape: f32[1,256], index: 2, kind: input, shape index: {}]   ;;  %s276_s3 = inlined_call_operand.hbm [shape: f32[2,256], index: 3, kind: output, shape index: {}]  }
   0x1   :  { %s17_s14 = scvt.s32.f32 %s273_s0  ;;  %v19_v0 = vld [vmem:[%s275_s2] sm:$0x3] }
   0x2   :  { %v18_v1 = vld [vmem:[%s274_s1] sm:$0x3] }
   0x3   :  { %v20_v2 = vstv %s17_s14 }
   0x4   :  { %v21_v3 = vmul.f32 %v20_v2, %v19_v0 }
   0x5   :  { %9 = vsyncpa [#allocation5], 0  ;;  %v204_v16 = vmov 683565275   ;;  %v205_v18 = vmov 2475754826  }
   0x6   :  { %v240_v4 = vadd.f32 %v21_v3, %v18_v1  ;;  %v206_v20 = vmov 2131351028   ;;  %v207_v22 = vmov 2102212464   ;;  %v208_v24 = vmov 920167782  }
   0x7   :  { %v209_v31 = vmov 1326507024   ;;  %s210_s0 = smov [#allocation4]  }
   0x8   :  { %v26_v5 = vand.u32 2139095040, %v240_v4  ;;  %v23_v7 = vand.u32 2147483647, %v240_v4  ;;  %vm25_vm7 = vcmp.lt.s32.totalorder %v240_v4, 0  ;;  %vm115_vm12 = vweird.f32 %v240_v4  ;;  %s152_s1 = sshll.u32 %s210_s0, 4  ;;  %s153_s1 = int_to_ptr.vmem [resolvable:$true] %s152_s1 }
   0x9   :  { %s180_s2 = scalar_lea.vmem %s153_s1, 64  ;;  %p185_p1 = scmp.lt.s32.totalorder %s153_s1, %s153_s1 }
   0xa   :  { %v27_v6 = vshrl.u32 %v26_v5, 23  ;;  %v30_v10 = vand.u32 8388607, %v23_v7  ;;  %vm24_vm8 = vcmp.le.f32.partialorder %v23_v7, 0.7853982  ;;  %p181_p0 = scmp.ne.s32.totalorder %s153_s1, %s180_s2  ;;  %p186_p2 = scmp.lt.s32.totalorder %s180_s2, %s180_s2 }
   0xc   :  { %v160_v8 = vadd.s32 4294967169, %v27_v6  ;;  %v31_v13 = vor.u32 8388608, %v30_v10  ;;  %p187_p3 = por %p186_p2, %p185_p1 }
   0xe   :  { %v33_v9 = vadd.s32 1, %v160_v8  ;;  %v71_v33 = vshll.u32 %v31_v13, 8  ;;  %p188_p4 = pnand %p187_p3, %p181_p0 }
  0x10   :  { %vm34_vm0 = vcmp.gt.s32.totalorder %v33_v9, 0 }
  0x11   :  { %v35_v11 = vsel %vm34_vm0, %v33_v9, 0 }
  0x12   :  { %v37_v12 = vand.u32 31, %v35_v11  ;;  %v36_v14 = vshrl.u32 %v35_v11, 5 }
  0x14   :  { %v38_v15 = vsub.s32 32, %v37_v12  ;;  %v40_v17 = vshll.u32 %v204_v16, %v37_v12  ;;  %v43_v19 = vshll.u32 %v205_v18, %v37_v12  ;;  %v46_v21 = vshll.u32 %v206_v20, %v37_v12 }
  0x15   :  { %v49_v23 = vshll.u32 %v207_v22, %v37_v12  ;;  %v52_v25 = vshll.u32 %v208_v24, %v37_v12  ;;  %vm55_vm1 = vcmp.lt.s32.totalorder %v36_v14, 1  ;;  %vm58_vm2 = vcmp.lt.s32.totalorder %v36_v14, 4 }
  0x16   :  { %v39_v26 = vshrl.u32 %v204_v16, %v38_v15  ;;  %v41_v27 = vshrl.u32 %v205_v18, %v38_v15  ;;  %v44_v28 = vshrl.u32 %v206_v20, %v38_v15  ;;  %v47_v29 = vshrl.u32 %v207_v22, %v38_v15 }
  0x17   :  { %v50_v30 = vshrl.u32 %v208_v24, %v38_v15  ;;  %v53_v32 = vshrl.u32 %v209_v31, %v38_v15  ;;  %vm56_vm3 = vcmp.lt.s32.totalorder %v36_v14, 2  ;;  %vm57_vm4 = vcmp.lt.s32.totalorder %v36_v14, 3 }
  0x18   :  { %v42_v34 = vor.u32 %v41_v27, %v40_v17  ;;  %v45_v35 = vor.u32 %v44_v28, %v43_v19  ;;  %v48_v36 = vor.u32 %v47_v29, %v46_v21 }
  0x19   :  { %v51_v37 = vor.u32 %v50_v30, %v49_v23  ;;  %v54_v38 = vor.u32 %v53_v32, %v52_v25  ;;  %v128_v25 = vlaneseq }
  0x1a   :  { %v59_v39 = vsel %vm55_vm1, %v39_v26, %v42_v34  ;;  %v60_v40 = vsel %vm58_vm2, %v48_v36, 2102212464  ;;  %v63_v41 = vsel %vm55_vm1, %v42_v34, %v45_v35  ;;  %v67_v42 = vsel %vm55_vm1, %v45_v35, %v48_v36 }
  0x1b   :  { %v61_v43 = vsel %vm57_vm4, %v45_v35, %v60_v40  ;;  %v64_v44 = vsel %vm58_vm2, %v51_v37, 920167782  ;;  %v68_v45 = vsel %vm58_vm2, %v54_v38, 1326507024  ;;  %v129_v27 = vshrl.u32 %v128_v25, 7 }
  0x1c   :  { %v65_v46 = vsel %vm57_vm4, %v48_v36, %v64_v44  ;;  %v69_v47 = vsel %vm57_vm4, %v51_v37, %v68_v45  ;;  %v62_v48 = vsel %vm56_vm3, %v59_v39, %v61_v43 }
  0x1d   :  { %v66_v49 = vsel %vm56_vm3, %v63_v41, %v65_v46  ;;  %v70_v50 = vsel %vm56_vm3, %v67_v42, %v69_v47  ;;  %v78_v55 = vmul.u32 %v71_v33, %v62_v48  ;;  %v130_v32 = vsub.s32 0, %v129_v27 }
  0x1e   :  { %v246_v51 = vmul.u32.u64.low %v71_v33, %v70_v50  ;;  %v247_v52 = vmul.u32.u64.high %v71_v33, %v70_v50, %v246_v51  ;;  %v249_v53 = vmul.u32.u64.low %v71_v33, %v66_v49  ;;  %v250_v54 = vmul.u32.u64.high %v71_v33, %v66_v49, %v249_v53 }
  0x1f   :  { %v134_v33 = vsub.s32 1, %v129_v27 }
  0x20   :  { %vm80_vm5 = vc.u32 %v247_v52, %v249_v53  ;;  %v81_v56 = vadd.s32 1, %v250_v54  ;;  %v79_v3 = vadd.s32 %v249_v53, %v247_v52 }
  0x22   :  { %v82_v57 = vsel %vm80_vm5, %v81_v56, %v250_v54 }
  0x23   :  { %v83_v58 = vadd.s32 %v82_v57, %v78_v55 }
  0x25   :  { %v84_v59 = vadd.s32 536870912, %v83_v58 }
  0x27   :  { %v85_v60 = vshrl.u32 %v84_v59, 30 }
  0x29   :  { %v86_v61 = vshll.u32 %v85_v60, 30  ;;  %v109_v17 = vsub.s32 4, %v85_v60 }
  0x2b   :  { %v87_v62 = vsub.s32 %v83_v58, %v86_v61  ;;  %v110_v20 = vsel %vm25_vm7, %v109_v17, %v85_v60 }
  0x2c   :  { %v112_v23 = vsel %vm24_vm8, 0, %v110_v20 }
  0x2d   :  { %v89_v63 = vsub.s32 0, %v87_v62  ;;  %v116_v24 = vadd.s32 3, %v112_v23 }
  0x2f   :  { %v161_v0 = vmin.u32 %v89_v63, %v87_v62  ;;  %v117_v26 = vand.u32 3, %v116_v24 }
  0x31   :  { %v91_v1 = vclz %v161_v0  ;;  %vm122_vm9 = vcmp.eq.s32.totalorder %v117_v26, 2  ;;  %vm119_vm10 = vcmp.eq.s32.totalorder %v117_v26, 0  ;;  %vm118_vm11 = vcmp.lt.s32.totalorder %v117_v26, 2 }
  0x33   :  { %v162_v2 = vadd.s32 4294967294, %v91_v1 }
  0x35   :  { %vm163_vm6 = vcmp.lt.s32.totalorder %v162_v2, 0 }
  0x36   :  { %v94_v5 = vsel %vm163_vm6, 0, %v162_v2 }
  0x37   :  { %v95_v6 = vsub.s32 32, %v94_v5  ;;  %v96_v8 = vshll.u32 %v87_v62, %v94_v5  ;;  %v99_v9 = vsub.s32 4294967266, %v94_v5 }
  0x39   :  { %v97_v10 = vshrl.u32 %v79_v3, %v95_v6  ;;  %v100_v11 = vadd.s32 127, %v99_v9 }
  0x3b   :  { %v98_v12 = vor.u32 %v97_v10, %v96_v8  ;;  %v101_v13 = vshll.u32 %v100_v11, 23 }
  0x3d   :  { %v102_v14 = vor.u32 4788187, %v101_v13  ;;  %v105_v15 = vcvt.s32.f32 %v98_v12 }
  0x3f   :  { %v103_v16 = vand.u32 2147483647, %v102_v14 }
  0x41   :  { %v106_v18 = vmul.f32 %v105_v15, %v103_v16 }
  0x43   :  { %v107_v19 = vxor.u32 2147483648, %v106_v18 }
  0x45   :  { %v108_v21 = vsel %vm25_vm7, %v107_v19, %v106_v18 }
  0x46   :  { %v111_v22 = vsel %vm24_vm8, %v240_v4, %v108_v21 }
  0x47   :  { %176 = vcosq.f32 %v111_v22 }
  0x48   :  { %178 = vsinq.f32 %v111_v22 }
  0x51   :  { %v177_v28 = vpop.eup %176 }
  0x52   :  { %v179_v29 = vpop.eup %178  ;;  %v123_v30 = vxor.u32 2147483648, %v177_v28 }
  0x53   :  { %v120_v31 = vxor.u32 2147483648, %v179_v29 }
  0x54   :  { %v124_v7 = vsel %vm122_vm9, %v123_v30, %v179_v29 }
  0x55   :  { %v121_v34 = vsel %vm119_vm10, %v177_v28, %v120_v31 }
  0x56   :  { %v125_v35 = vsel %vm118_vm11, %v121_v34, %v124_v7 }
  0x57   :  { %v126_v36 = vsel %vm115_vm12, nan, %v125_v35 }
  0x58   :  { %v131_v37 = vrot.slane %v126_v36, %v130_v32  ;;  %v135_v38 = vrot.slane %v126_v36, %v134_v33 }
  0x5a   :  { %v136_v39 = vcombine.low %v131_v37, %v135_v38 }
  0x5c   :  { %164 = vst.sshfl [vmem:[#allocation4] sm:$0x33 pattern:$0x76325410] %v136_v39 }
  0x5d   :  { %191 = shalt.err (!%p188_p4)
}
  0x5e   :  { %s192_s21 = scalar_lea.hbm %s276_s3, 64 }
  0x5f   :  { %p193_p5 = scmp.ne.s32.totalorder %s276_s3, %s192_s21  ;;  %p196_p6 = scmp.lt.u32.totalorder %s192_s21, %s276_s3 }
  0x61   :  { %p198_p7 = pnand %p196_p6, %p193_p5 }
  0x63   :  { %201 = shalt.err (!%p198_p7)
}
  0x64   :  { %155 = dma.vmem_to_hbm [thread:$0]  %s153_s1, 64, %s276_s3, [#allocation5]  }
  0x65   :  { %202 = dma.done.wait [#allocation5], 64  }
  0x66   :  { %203 = vsyncadd [#allocation5], 4294967232 }
  0x67   :  { %159 = vsyncpa [#allocation5], 1 }

</bundles_post_ra>
